<compile_context>
chip_gen: v7x
topology: tpu7x:2x2x1
jax: 0.10.0
libtpu: 0.0.40
codegen_flags: <defaults>
</compile_context>

<pallas_src>
import jax
import jax.numpy as jnp
from jax.experimental import pallas as pl
from jax.experimental.pallas import tpu as pltpu


def _round_up(x, m):
    return (x + m - 1) // m * m


def _cdiv(a, b):
    return (a + b - 1) // b


# ----------------------------- kernels --------------------------------------

def _linear_single_block_kernel(x_ref, w_ref, b_ref, o_ref):
    # Whole (K-padded) problem resident in VMEM; one MXU matmul + fused bias.
    acc = jnp.dot(x_ref[...], w_ref[...], preferred_element_type=jnp.float32)
    o_ref[...] = (acc + b_ref[...]).astype(o_ref.dtype)


def _linear_2d_kernel(x_ref, w_ref, b_ref, o_ref):
    # Full-K tile: single MXU pass per (i, j) block, bias fused into the store.
    acc = jnp.dot(x_ref[...], w_ref[...], preferred_element_type=jnp.float32)
    o_ref[...] = (acc + b_ref[...]).astype(o_ref.dtype)


def _linear_3d_kernel(x_ref, w_ref, b_ref, o_ref):
    # K chunked: accumulate directly into the resident f32 output block
    # (no separate accumulator scratch), bias added once in the epilogue.
    k = pl.program_id(2)
    part = jnp.dot(x_ref[...], w_ref[...], preferred_element_type=jnp.float32)

    @pl.when(k == 0)
    def _():
        o_ref[...] = part

    @pl.when(k > 0)
    def _():
        o_ref[...] += part

    @pl.when(k == pl.num_programs(2) - 1)
    def _():
        o_ref[...] += b_ref[...]


# ----------------------------- wrapper ---------------------------------------

_VMEM_LIMIT = 48 * 1024 * 1024       # <= v7x physical (64 MiB), fine on v5e/v6e
_TILE_BUDGET = 28 * 1024 * 1024      # double-buffered working-set budget
_SINGLE_BLOCK_BYTES = 6 * 1024 * 1024


def _pick_tiles(M, N, K_pad, in_bytes, budget):
    sub = 16 if in_bytes < 4 else 8          # bf16 prefers 16-row sublane tiles
    tm_max = min(512, _round_up(M, sub))
    tn_max = min(512, _round_up(N, 128))

    def working_set(tm, tn, tk):
        # double-buffered x / W / bias input tiles + resident f32 output block
        return (2 * (tm * tk + tk * tn) * in_bytes
                + 2 * tn * 4 + 2 * tm * tn * 4)

    chosen = None
    # Prefer full-K tiles (2-D grid, no accumulator revisit, minimal re-reads).
    for tm in (tm_max, min(tm_max, 256), min(tm_max, 128)):
        for tn in (tn_max, min(tn_max, 256), min(tn_max, 128)):
            if working_set(tm, tn, K_pad) <= budget:
                chosen = (tm, tn, K_pad)
                break
        if chosen is not None:
            break

    if chosen is None:
        # Very large K: chunk the reduction (3-D grid) with moderate out tiles.
        tm, tn = min(tm_max, 256), min(tn_max, 256)
        tk = K_pad
        while tk > 1024 and working_set(tm, tn, tk) > budget:
            tk = _round_up(tk // 2, 128)
        chosen = (tm, tn, tk)

    tm, tn, tk = chosen
    # v7x megacore: keep >= 2 blocks along a parallel axis if tile growth
    # collapsed the parallel grid to 1x1 (harmless on v5e/v6e).
    if _cdiv(M, tm) * _cdiv(N, tn) == 1:
        if tn >= 256:
            tn //= 2
        elif tm >= 2 * sub:
            tm = _round_up(tm // 2, sub)
    return tm, tn, tk


def linear_pallas(x, weight, bias, *, compute_dtype=None):
    """y = x @ weight.T + bias, mirroring torch.nn.Linear.forward.

    x:      (..., K) float32
    weight: (N, K)   float32  (PyTorch convention)
    bias:   (N,)     float32
    compute_dtype: optional MXU input dtype (e.g. jnp.bfloat16).  Accumulation
      is always f32; None keeps the input dtype (bit-faithful reference path).
    """
    orig_shape = x.shape
    K = orig_shape[-1]
    x2 = x.reshape(-1, K)
    M = x2.shape[0]
    N = weight.shape[0]
    out_dtype = jnp.float32

    in_dtype = compute_dtype if compute_dtype is not None else x2.dtype
    in_bytes = jnp.dtype(in_dtype).itemsize

    # Only K is padded (zero-padding contributes 0 to the contraction).
    K_pad = _round_up(K, 128)
    if K_pad != K:
        x2 = jnp.pad(x2, ((0, 0), (0, K_pad - K)))
        weight = jnp.pad(weight, ((0, 0), (0, K_pad - K)))
    # One-time transpose to (K_pad, N): NN contraction, lane-dense N operand.
    w_t = weight.T
    if compute_dtype is not None:
        x2 = x2.astype(compute_dtype)
        w_t = w_t.astype(compute_dtype)      # halves W HBM traffic for bf16
    b2 = bias.reshape(1, N).astype(jnp.float32)

    total_bytes = in_bytes * (M * K_pad + K_pad * N) + 4 * (M * N + N)
    cost = pl.CostEstimate(flops=2 * M * N * K_pad,
                           transcendentals=0,
                           bytes_accessed=total_bytes)

    if total_bytes <= _SINGLE_BLOCK_BYTES:
        # Small problems: grid-less, whole arrays resident in VMEM.
        # TODO(synk): for truly tiny GEMVs a plain XLA dot may beat the fixed
        # kernel-launch + DMA latency; batch/fuse at the caller when possible.
        out = pl.pallas_call(
            _linear_single_block_kernel,
            out_shape=jax.ShapeDtypeStruct((M, N), out_dtype),
            in_specs=[pl.BlockSpec(memory_space=pltpu.MemorySpace.VMEM)] * 3,
            out_specs=pl.BlockSpec(memory_space=pltpu.MemorySpace.VMEM),
            cost_estimate=cost,
            compiler_params=pltpu.CompilerParams(
                vmem_limit_bytes=_VMEM_LIMIT),
        )(x2, w_t, b2)
        return out.reshape(orig_shape[:-1] + (N,))

    tm, tn, tk = _pick_tiles(M, N, K_pad, in_bytes, _TILE_BUDGET)
    grid_m, grid_n = _cdiv(M, tm), _cdiv(N, tn)

    if tk >= K_pad:
        # 2-D grid, full-K tiles.  j (N) is innermost, so the x block index is
        # invariant across the inner loop and x is DMA'd once per M-strip.
        out = pl.pallas_call(
            _linear_2d_kernel,
            out_shape=jax.ShapeDtypeStruct((M, N), out_dtype),
            grid=(grid_m, grid_n),
            in_specs=[
                pl.BlockSpec((tm, K_pad), lambda i, j: (i, 0)),
                # TODO(synk): on v5e, if the streamed W DMA is still exposed,
                # add pipeline_mode=pl.Buffered(3) on this spec and sweep.
                pl.BlockSpec((K_pad, tn), lambda i, j: (0, j)),
                pl.BlockSpec((1, tn), lambda i, j: (0, j)),
            ],
            out_specs=pl.BlockSpec((tm, tn), lambda i, j: (i, j)),
            cost_estimate=cost,
            compiler_params=pltpu.CompilerParams(
                dimension_semantics=("parallel", "parallel"),
                vmem_limit_bytes=_VMEM_LIMIT),
        )(x2, w_t, b2)
    else:
        # 3-D grid, K (reduction) last / "arbitrary"; accumulate into o_ref.
        out = pl.pallas_call(
            _linear_3d_kernel,
            out_shape=jax.ShapeDtypeStruct((M, N), out_dtype),
            grid=(grid_m, grid_n, _cdiv(K_pad, tk)),
            in_specs=[
                pl.BlockSpec((tm, tk), lambda i, j, k: (i, k)),
                pl.BlockSpec((tk, tn), lambda i, j, k: (k, j)),
                pl.BlockSpec((1, tn), lambda i, j, k: (0, j)),
            ],
            out_specs=pl.BlockSpec((tm, tn), lambda i, j, k: (i, j)),
            cost_estimate=cost,
            compiler_params=pltpu.CompilerParams(
                dimension_semantics=("parallel", "parallel", "arbitrary"),
                vmem_limit_bytes=_VMEM_LIMIT),
        )(x2, w_t, b2)

    return out.reshape(orig_shape[:-1] + (N,))


# ----------------------------- demo / checks ---------------------------------

if __name__ == "__main__":
    input_dim = 10
    output_dim = 16
    batch = 8

    key = jax.random.PRNGKey(0)
    kx, kw, kb = jax.random.split(key, 3)

    x = jax.random.normal(kx, (batch, input_dim), dtype=jnp.float32)
    # Deterministic "nn.Linear" parameter init (uniform in +-1/sqrt(fan_in)).
    bound = 1.0 / (input_dim ** 0.5)
    weight = jax.random.uniform(
        kw, (output_dim, input_dim), minval=-bound, maxval=bound,
        dtype=jnp.float32)
    bias = jax.random.uniform(
        kb, (output_dim,), minval=-bound, maxval=bound, dtype=jnp.float32)

    y = linear_pallas(x, weight, bias)
    jax.block_until_ready(y)
    y_ref = x @ weight.T + bias
    assert y.shape == (batch, output_dim)
    assert jnp.allclose(y, y_ref, atol=1e-5, rtol=1e-5)

    # Tiled full-K path, bf16 MXU inputs with f32 accumulation.
    kx2, kw2, kb2 = jax.random.split(jax.random.PRNGKey(1), 3)
    M2, K2, N2 = 1024, 2048, 1536
    x2 = jax.random.normal(kx2, (M2, K2), dtype=jnp.float32)
    w2 = jax.random.normal(kw2, (N2, K2), dtype=jnp.float32) * 0.02
    b2 = jax.random.normal(kb2, (N2,), dtype=jnp.float32)
    y2 = linear_pallas(x2, w2, b2, compute_dtype=jnp.bfloat16)
    jax.block_until_ready(y2)
    y2_ref = x2 @ w2.T + b2
    assert jnp.allclose(y2, y2_ref, atol=3e-2, rtol=3e-2)

    # Tiled f32 path with awkward, non-tile-multiple M / N (masked edge blocks).
    kx3, kw3, kb3 = jax.random.split(jax.random.PRNGKey(2), 3)
    M3, K3, N3 = 1000, 1000, 700
    x3 = jax.random.normal(kx3, (M3, K3), dtype=jnp.float32)
    w3 = jax.random.normal(kw3, (N3, K3), dtype=jnp.float32) * 0.02
    b3 = jax.random.normal(kb3, (N3,), dtype=jnp.float32)
    y3 = linear_pallas(x3, w3, b3)
    jax.block_until_ready(y3)
    y3_ref = x3 @ w3.T + b3
    assert jnp.allclose(y3, y3_ref, atol=1e-3, rtol=1e-3)

    print("KERNEL_OK")
</pallas_src>

<mosaic_0001>
module attributes {stable_mosaic.version = 11 : i64} {
  func.func @_linear_single_block_kernel(%arg0: memref<8x128xf32, #tpu.memory_space<vmem>>, %arg1: memref<128x16xf32, #tpu.memory_space<vmem>>, %arg2: memref<1x16xf32, #tpu.memory_space<vmem>>, %arg3: memref<8x16xf32, #tpu.memory_space<vmem>>) attributes {dimension_semantics = [], scalar_prefetch = 0 : i64, scratch_operands = 0 : i64, tpu.core_type = #tpu.core_type<tc>} {
    %c0 = arith.constant 0 : index
    %c0_0 = arith.constant 0 : index
    %0 = vector.load %arg0[%c0, %c0_0] : memref<8x128xf32, #tpu.memory_space<vmem>>, vector<8x128xf32>
    %c0_1 = arith.constant 0 : index
    %c0_2 = arith.constant 0 : index
    %1 = vector.load %arg1[%c0_1, %c0_2] : memref<128x16xf32, #tpu.memory_space<vmem>>, vector<128x16xf32>
    %cst = arith.constant dense<0.000000e+00> : vector<8x16xf32>
    %2 = tpu.matmul %0, %1, %cst {dimension_numbers = #tpu.dot_dimension_numbers<[1], [0], [0], [1], [0, 0, 1, 1], [], []>} : vector<8x128xf32>, vector<128x16xf32>, vector<8x16xf32> -> vector<8x16xf32>
    %c0_3 = arith.constant 0 : index
    %c0_4 = arith.constant 0 : index
    %3 = vector.load %arg2[%c0_3, %c0_4] : memref<1x16xf32, #tpu.memory_space<vmem>>, vector<1x16xf32>
    %4 = vector.broadcast %3 : vector<1x16xf32> to vector<8x16xf32>
    %5 = arith.addf %2, %4 : vector<8x16xf32>
    %c0_5 = arith.constant 0 : index
    %c0_6 = arith.constant 0 : index
    %6 = vector.load %arg3[%c0_5, %c0_6] : memref<8x16xf32, #tpu.memory_space<vmem>>, vector<8x16xf32>
    tpu.vector_store %arg3[%c0_5, %c0_6], %5 {strides = array<i32>} : memref<8x16xf32, #tpu.memory_space<vmem>>, vector<8x16xf32>,
    return
  }
}

</mosaic_0001>

<bundles_post_ra>
// kernel: tpu_custom_call.1
= control target key start
LH: loop header
LB: loop body
LE: loop exit
PB: predicated region body
PF: predicated region fallthrough
CT: control target
= control target key end

     0   :  { %v230_v3 = vmov 0.0|0.0   ;;  %vm231_vm0 = vmmov 0   ;;  %v232_v6 = vmov 0.0   ;;  %s320_s0 = inlined_call_operand.vmem [shape: f32[8,128], index: 0, kind: input, shape index: {}]   ;;  %s321_s1 = inlined_call_operand.vmem [shape: f32[128,16], index: 1, kind: input, shape index: {}]   ;;  %s322_s2 = inlined_call_operand.vmem [shape: f32[1,16], index: 2, kind: input, shape index: {}]   ;;  %s323_s3 = inlined_call_operand.hbm [shape: f32[8,16], index: 3, kind: output, shape index: {}]  }
   0x1   :  { %v16_v0 = vld [vmem:[%s321_s1] sm:$0xff]  ;;  %v17_v1 = vld [vmem:[%s321_s1 + $0x8] sm:$0xff]  ;;  %v18_v2 = vld [vmem:[%s321_s1 + $0x10] sm:$0xff]  ;;  %178 = vmatprep.subr.bf16.mxu0 %v230_v3  ;;  %175 = vmatprep.mubr.msk.f32.mxu0 %vm231_vm0, %v232_v6 }
   0x2   :  { %v179_v4 = vpack.c.bf16 %v17_v1, %v16_v0  ;;  %v19_v5 = vld [vmem:[%s321_s1 + $0x18] sm:$0xff]  ;;  %v20_v8 = vld [vmem:[%s321_s1 + $0x20] sm:$0xff]  ;;  %v21_v9 = vld [vmem:[%s321_s1 + $0x28] sm:$0xff] }
   0x3   :  { %v182_v7 = vpack.c.bf16 %v19_v5, %v18_v2 }
   0x4   :  { %180 = vmatpush3.bf16.msra.mxu0 %v179_v4 }
   0x5   :  { %181 = vmatprep.subr.bf16.mxu0 %v230_v3 }
   0x6   :  { %8 = vsyncpa [#allocation3], 0  ;;  %v185_v10 = vpack.c.bf16 %v21_v9, %v20_v8  ;;  %v22_v11 = vld [vmem:[%s321_s1 + $0x30] sm:$0xff]  ;;  %v23_v12 = vld [vmem:[%s321_s1 + $0x38] sm:$0xff]  ;;  %s233_s21 = smov [#allocation2]   ;;  %vm109_vm1 = vcmask 130048  }
   0x7   :  { %v188_v13 = vpack.c.bf16 %v23_v12, %v22_v11  ;;  %v24_v14 = vld [vmem:[%s321_s1 + $0x40] sm:$0xff]  ;;  %v25_v15 = vld [vmem:[%s321_s1 + $0x48] sm:$0xff]  ;;  %v26_v17 = vld [vmem:[%s321_s1 + $0x50] sm:$0xff]  ;;  %s117_s22 = sshll.u32 %s233_s21, 4  ;;  %s118_s22 = int_to_ptr.vmem [resolvable:$true] %s117_s22 }
   0x8   :  { %183 = vmatpush3.bf16.msra.mxu0 %v182_v7  ;;  %v191_v16 = vpack.c.bf16 %v25_v15, %v24_v14  ;;  %v27_v18 = vld [vmem:[%s321_s1 + $0x58] sm:$0xff]  ;;  %v28_v20 = vld [vmem:[%s321_s1 + $0x60] sm:$0xff]  ;;  %v29_v21 = vld [vmem:[%s321_s1 + $0x68] sm:$0xff]  ;;  %p211_p1 = scmp.lt.s32.totalorder %s118_s22, %s118_s22 }
   0x9   :  { %184 = vmatprep.subr.bf16.mxu0 %v230_v3  ;;  %v194_v19 = vpack.c.bf16 %v27_v18, %v26_v17  ;;  %v197_v22 = vpack.c.bf16 %v29_v21, %v28_v20  ;;  %v30_v23 = vld [vmem:[%s321_s1 + $0x70] sm:$0xff]  ;;  %v31_v24 = vld [vmem:[%s321_s1 + $0x78] sm:$0xff]  ;;  %v15_v26 = vld [vmem:[%s320_s0] sm:$0xff]  ;;  %s206_s1 = scalar_lea.vmem %s118_s22, 128 }
   0xa   :  { %v200_v25 = vpack.c.bf16 %v31_v24, %v30_v23  ;;  %v125_v27 = vld [vmem:[%s322_s2] ss:$0 sm:$0xff]  ;;  %p207_p0 = scmp.ne.s32.totalorder %s118_s22, %s206_s1  ;;  %p212_p2 = scmp.lt.s32.totalorder %s206_s1, %s206_s1 }
   0xc   :  { %186 = vmatpush3.bf16.msra.mxu0 %v185_v10  ;;  %p213_p3 = por %p212_p2, %p211_p1 }
   0xd   :  { %187 = vmatprep.subr.bf16.mxu0 %v230_v3 }
   0xe   :  { %p214_p4 = pnand %p213_p3, %p207_p0 }
  0x10   :  { %189 = vmatpush3.bf16.msra.mxu0 %v188_v13 }
  0x11   :  { %190 = vmatprep.subr.bf16.mxu0 %v230_v3 }
  0x14   :  { %192 = vmatpush3.bf16.msra.mxu0 %v191_v16 }
  0x15   :  { %193 = vmatprep.subr.bf16.mxu0 %v230_v3 }
  0x18   :  { %195 = vmatpush3.bf16.msra.mxu0 %v194_v19 }
  0x19   :  { %196 = vmatprep.subr.bf16.mxu0 %v230_v3 }
  0x1c   :  { %198 = vmatpush3.bf16.msra.mxu0 %v197_v22 }
  0x1d   :  { %199 = vmatprep.subr.bf16.mxu0 %v230_v3 }
  0x20   :  { %201 = vmatpush3.bf16.msra.mxu0 %v200_v25 }
  0x23   :  { %176 = vmatmul.mubr.f32.vlgmr.msra.gmra.mrb[0].mxu0 %v15_v26 }
  0xf6   :  { %v105_v28 = vpop.f32.mrb[0].mxu0 }
  0xf7   :  { %v106_v29 = vadd.f32 %v125_v27, %v105_v28  ;;  %v177_v30 = vpop.f32.mrb[1].mxu0 }
  0xf9   :  { %110 = vst.msk [vmem:[#allocation2] sm:$0xff] %vm109_vm1, %v106_v29 }
  0xfa   :  { %217 = shalt.err (!%p214_p4)
}
  0xfb   :  { %s218_s24 = scalar_lea.hbm %s323_s3, 128 }
  0xfc   :  { %p219_p5 = scmp.ne.s32.totalorder %s323_s3, %s218_s24  ;;  %p222_p6 = scmp.lt.u32.totalorder %s218_s24, %s323_s3 }
  0xfe   :  { %p224_p7 = pnand %p222_p6, %p219_p5 }
 0x100   :  { %227 = shalt.err (!%p224_p7)
}
 0x101   :  { %120 = dma.vmem_to_hbm [thread:$0]  %s118_s22, 128, %s323_s3, [#allocation3]  }
 0x102   :  { %228 = dma.done.wait [#allocation3], 128  }
 0x103   :  { %229 = vsyncadd [#allocation3], 4294967168 }
 0x104   :  { %124 = vsyncpa [#allocation3], 1 }

</bundles_post_ra>
